<compile_context>
chip_gen: v5e
topology: v5e:2x2
jax: 0.10.0
libtpu: 0.0.40
codegen_flags: <defaults>
</compile_context>

<pallas_src>
import functools

import jax
import jax.numpy as jnp
from jax.experimental import pallas as pl
from jax.experimental.pallas import tpu as pltpu

_LANE = 128


def _layer_norm2d_kernel(x_ref, w_ref, b_ref, o_ref, *, eps, inv_c):
    # x_ref: (1, C, T)   w_ref/b_ref: (1, C, 1)   o_ref: (1, C, T)
    x = x_ref[...].astype(jnp.float32)
    # Single-pass moments over the channel axis (axis=1).
    s1 = jnp.sum(x, axis=1, keepdims=True)
    s2 = jnp.sum(x * x, axis=1, keepdims=True)
    mu = s1 * inv_c
    var = jnp.maximum(s2 * inv_c - mu * mu, 0.0)   # clamp tiny negative cancellation
    y = (x - mu) * jax.lax.rsqrt(var + eps)        # rsqrt -> EUP slot (free-ish)
    w = w_ref[...].astype(jnp.float32)
    b = b_ref[...].astype(jnp.float32)
    o_ref[...] = (w * y + b).astype(o_ref.dtype)


def _round_up(x, m):
    return (x + m - 1) // m * m


def _vmem_budget_bytes():
    """(tile budget, vmem_limit_bytes), generation-aware."""
    try:
        cap = pltpu.get_tpu_info().vmem_capacity_bytes
    except Exception:
        cap = 0
    if cap >= 96 * 1024 * 1024:
        # v5e / v6e: 128 MiB physical VMEM -> generous tiles.
        return 40 * 1024 * 1024, 64 * 1024 * 1024
    # v7x (64 MiB physical, 32 MiB scoped default) or unknown -> conservative.
    return 20 * 1024 * 1024, 48 * 1024 * 1024


def _pick_hw_tile(hw, c, in_itemsize, out_itemsize, vmem_budget_bytes,
                  max_tile=2048):
    """Largest lane tile T (multiple of 128) fitting the VMEM budget.

    Budget counts double-buffered in/out blocks plus ~2 block-sized f32 temps
    (covers the f32 upcast / working values when x is bf16).
    """
    hw_full = _round_up(hw, _LANE)
    bytes_per_lane = c * (2 * in_itemsize + 2 * out_itemsize + 2 * 4)
    t_cap = max(_LANE, (vmem_budget_bytes // bytes_per_lane) // _LANE * _LANE)
    t_cap = min(t_cap, max_tile)
    return min(hw_full, t_cap)


def layer_norm2d(x, weight, bias, eps=1e-6):
    """x: (N, C, H, W); weight, bias: (C,). Matches PyTorch LayerNorm2d forward."""
    N, C, H, W = x.shape
    HW = H * W
    in_item = jnp.dtype(x.dtype).itemsize
    # Output dtype matches input (module semantics).  Emitting bf16 here halves
    # writeback bytes if the consumer tolerates it (largest win on v5e).
    out_dtype = x.dtype
    out_item = jnp.dtype(out_dtype).itemsize

    vmem_budget, vmem_limit = _vmem_budget_bytes()
    T = _pick_hw_tile(HW, C, in_item, out_item, vmem_budget)
    num_hw_tiles = pl.cdiv(HW, T)          # ragged tail handled by masked store

    x2 = x.reshape(N, C, HW)
    w3 = weight.reshape(1, C, 1)
    b3 = bias.reshape(1, C, 1)

    kernel = functools.partial(_layer_norm2d_kernel, eps=eps, inv_c=1.0 / C)

    cost = pl.CostEstimate(
        flops=int(7 * N * C * HW),
        transcendentals=int(N * HW),            # one rsqrt per spatial position
        bytes_accessed=int(N * C * HW * (in_item + out_item) + 2 * C * 4),
    )

    out = pl.pallas_call(
        kernel,
        out_shape=jax.ShapeDtypeStruct((N, C, HW), out_dtype),
        grid_spec=pltpu.PrefetchScalarGridSpec(
            num_scalar_prefetch=0,
            grid=(N, num_hw_tiles),
            in_specs=[
                # x: one lane-dense (1, C, T) tile per grid step.  On v7x,
                # sweep pipeline_mode=pl.Buffered(3) here (and add the third
                # buffer to bytes_per_lane in _pick_hw_tile) if DMA latency is
                # still exposed at the default depth of 2.
                pl.BlockSpec((1, C, T), lambda n, t: (n, 0, t)),
                # weight / bias: constant block index -> stay resident in VMEM.
                pl.BlockSpec((1, C, 1), lambda n, t: (0, 0, 0)),
                pl.BlockSpec((1, C, 1), lambda n, t: (0, 0, 0)),
            ],
            out_specs=pl.BlockSpec((1, C, T), lambda n, t: (n, 0, t)),
        ),
        compiler_params=pltpu.CompilerParams(
            dimension_semantics=("parallel", "parallel"),
            vmem_limit_bytes=vmem_limit,
        ),
        cost_estimate=cost,
    )(x2, w3, b3)

    return out.reshape(N, C, H, W)


def _reference(x, weight, bias, eps=1e-6):
    mu = jnp.mean(x, axis=1, keepdims=True)
    var = jnp.mean((x - mu) ** 2, axis=1, keepdims=True)
    y = (x - mu) / jnp.sqrt(var + eps)
    return weight.reshape(1, -1, 1, 1) * y + bias.reshape(1, -1, 1, 1)


if __name__ == "__main__":
    key = jax.random.PRNGKey(0)

    # Test 1: module-default init (ones/zeros), HW already a multiple of 128.
    N, C, H, W = 2, 4, 16, 16
    x = jax.random.normal(key, (N, C, H, W), dtype=jnp.float32)
    weight = jnp.ones((C,), dtype=jnp.float32)
    bias = jnp.zeros((C,), dtype=jnp.float32)

    out = layer_norm2d(x, weight, bias, eps=1e-6)
    out = jax.block_until_ready(out)
    ref = _reference(x, weight, bias, eps=1e-6)
    assert out.shape == (N, C, H, W)
    assert jnp.allclose(out, ref, atol=1e-5, rtol=1e-5)

    # Test 2: non-trivial weight/bias and HW not a multiple of 128
    # (exercises the in-kernel masked ragged-tail path; no wrapper pad/slice).
    k1, k2, k3 = jax.random.split(key, 3)
    N2, C2, H2, W2 = 2, 8, 10, 10
    x2 = jax.random.normal(k1, (N2, C2, H2, W2), dtype=jnp.float32)
    w2 = 1.0 + 0.1 * jax.random.normal(k2, (C2,), dtype=jnp.float32)
    b2 = 0.1 * jax.random.normal(k3, (C2,), dtype=jnp.float32)

    out2 = layer_norm2d(x2, w2, b2, eps=1e-6)
    out2 = jax.block_until_ready(out2)
    ref2 = _reference(x2, w2, b2, eps=1e-6)
    assert out2.shape == (N2, C2, H2, W2)
    assert jnp.allclose(out2, ref2, atol=1e-5, rtol=1e-5)

    print("KERNEL_OK")
</pallas_src>

<mosaic_0001>
module attributes {stable_mosaic.version = 11 : i64} {
  func.func @_layer_norm2d_kernel(%arg0: i32, %arg1: i32, %arg2: memref<1x4x256xf32, #tpu.memory_space<vmem>>, %arg3: memref<1x4x1xf32, #tpu.memory_space<vmem>>, %arg4: memref<1x4x1xf32, #tpu.memory_space<vmem>>, %arg5: memref<1x4x256xf32, #tpu.memory_space<vmem>>) attributes {dimension_semantics = [#tpu.dimension_semantics<parallel>, #tpu.dimension_semantics<parallel>], iteration_bounds = array<i64: 2, 1>, scalar_prefetch = 0 : i64, scratch_operands = 0 : i64, tpu.core_type = #tpu.core_type<tc>, window_params = [{transform_indices = @transform_0, window_bounds = array<i64: 1, 4, 256>}, {pipeline_mode = #tpu.pipeline_mode<synchronous>, transform_indices = @transform_1, window_bounds = array<i64: 1, 4, 1>}, {pipeline_mode = #tpu.pipeline_mode<synchronous>, transform_indices = @transform_2, window_bounds = array<i64: 1, 4, 1>}, {transform_indices = @transform_3, window_bounds = array<i64: 1, 4, 256>}]} {
    %c0 = arith.constant 0 : index
    %c0_0 = arith.constant 0 : index
    %c0_1 = arith.constant 0 : index
    %0 = vector.load %arg2[%c0, %c0_0, %c0_1] : memref<1x4x256xf32, #tpu.memory_space<vmem>>, vector<1x4x256xf32>
    %cst = arith.constant dense<0.000000e+00> : vector<1x256xf32>
    %1 = vector.multi_reduction <add>, %0, %cst [1] : vector<1x4x256xf32> to vector<1x256xf32>
    %2 = vector.shape_cast %1 : vector<1x256xf32> to vector<1x1x256xf32>
    %3 = arith.mulf %0, %0 : vector<1x4x256xf32>
    %cst_2 = arith.constant dense<0.000000e+00> : vector<1x256xf32>
    %4 = vector.multi_reduction <add>, %3, %cst_2 [1] : vector<1x4x256xf32> to vector<1x256xf32>
    %5 = vector.shape_cast %4 : vector<1x256xf32> to vector<1x1x256xf32>
    %cst_3 = arith.constant 2.500000e-01 : f32
    %6 = vector.broadcast %cst_3 : f32 to vector<1x1x256xf32>
    %7 = arith.mulf %2, %6 : vector<1x1x256xf32>
    %cst_4 = arith.constant 2.500000e-01 : f32
    %8 = vector.broadcast %cst_4 : f32 to vector<1x1x256xf32>
    %9 = arith.mulf %5, %8 : vector<1x1x256xf32>
    %10 = arith.mulf %7, %7 : vector<1x1x256xf32>
    %11 = arith.subf %9, %10 : vector<1x1x256xf32>
    %cst_5 = arith.constant 0.000000e+00 : f32
    %12 = vector.broadcast %cst_5 : f32 to vector<1x1x256xf32>
    %13 = arith.maximumf %11, %12 : vector<1x1x256xf32>
    %14 = vector.broadcast %7 : vector<1x1x256xf32> to vector<1x4x256xf32>
    %15 = arith.subf %0, %14 : vector<1x4x256xf32>
    %cst_6 = arith.constant 9.99999997E-7 : f32
    %16 = vector.broadcast %cst_6 : f32 to vector<1x1x256xf32>
    %17 = arith.addf %13, %16 : vector<1x1x256xf32>
    %18 = math.rsqrt %17 : vector<1x1x256xf32>
    %19 = vector.broadcast %18 : vector<1x1x256xf32> to vector<1x4x256xf32>
    %20 = arith.mulf %15, %19 : vector<1x4x256xf32>
    %c0_7 = arith.constant 0 : index
    %c0_8 = arith.constant 0 : index
    %c0_9 = arith.constant 0 : index
    %21 = vector.load %arg3[%c0_7, %c0_8, %c0_9] : memref<1x4x1xf32, #tpu.memory_space<vmem>>, vector<1x4x1xf32>
    %c0_10 = arith.constant 0 : index
    %c0_11 = arith.constant 0 : index
    %c0_12 = arith.constant 0 : index
    %22 = vector.load %arg4[%c0_10, %c0_11, %c0_12] : memref<1x4x1xf32, #tpu.memory_space<vmem>>, vector<1x4x1xf32>
    %23 = vector.broadcast %21 : vector<1x4x1xf32> to vector<1x4x256xf32>
    %24 = arith.mulf %23, %20 : vector<1x4x256xf32>
    %25 = vector.broadcast %22 : vector<1x4x1xf32> to vector<1x4x256xf32>
    %26 = arith.addf %24, %25 : vector<1x4x256xf32>
    %c0_13 = arith.constant 0 : index
    %c0_14 = arith.constant 0 : index
    %c0_15 = arith.constant 0 : index
    %27 = vector.load %arg5[%c0_13, %c0_14, %c0_15] : memref<1x4x256xf32, #tpu.memory_space<vmem>>, vector<1x4x256xf32>
    tpu.vector_store %arg5[%c0_13, %c0_14, %c0_15], %26 {strides = array<i32>} : memref<1x4x256xf32, #tpu.memory_space<vmem>>, vector<1x4x256xf32>,
    return
  }
  func.func @transform_0(%arg0: i32, %arg1: i32) -> (i32, i32, i32) {
    %c0_i32 = arith.constant 0 : i32
    %c0_i32_0 = arith.constant 0 : i32
    return %arg0, %c0_i32, %arg1 : i32, i32, i32
  }
  func.func @transform_1(%arg0: i32, %arg1: i32) -> (i32, i32, i32) {
    %c0_i32 = arith.constant 0 : i32
    %c0_i32_0 = arith.constant 0 : i32
    %c0_i32_1 = arith.constant 0 : i32
    %c0_i32_2 = arith.constant 0 : i32
    return %c0_i32, %c0_i32_0, %c0_i32_1 : i32, i32, i32
  }
  func.func @transform_2(%arg0: i32, %arg1: i32) -> (i32, i32, i32) {
    %c0_i32 = arith.constant 0 : i32
    %c0_i32_0 = arith.constant 0 : i32
    %c0_i32_1 = arith.constant 0 : i32
    %c0_i32_2 = arith.constant 0 : i32
    return %c0_i32, %c0_i32_0, %c0_i32_1 : i32, i32, i32
  }
  func.func @transform_3(%arg0: i32, %arg1: i32) -> (i32, i32, i32) {
    %c0_i32 = arith.constant 0 : i32
    %c0_i32_0 = arith.constant 0 : i32
    return %arg0, %c0_i32, %arg1 : i32, i32, i32
  }
}

</mosaic_0001>

<bundles_post_ra>
// kernel: tpu_custom_call.1
= control target key start
LH: loop header
LB: loop body
LE: loop exit
PB: predicated region body
PF: predicated region fallthrough
CT: control target
= control target key end

     0   :  { %8 = vsyncpa [#allocation3], 0  ;;  %s790_s0 = inlined_call_operand.hbm [shape: f32[2,4,256], index: 0, kind: input, shape index: {}]   ;;  %s791_s1 = inlined_call_operand.vmem [shape: f32[1,4,1], index: 1, kind: input, shape index: {}]   ;;  %s792_s2 = inlined_call_operand.vmem [shape: f32[1,4,1], index: 2, kind: input, shape index: {}]   ;;  %s793_s3 = inlined_call_operand.hbm [shape: f32[2,4,256], index: 3, kind: output, shape index: {}]  }
   0x1   :  { %10 = vsyncpa [#allocation3 + $0x1], 0 }
   0x2   :  { %11 = vsyncpa [#allocation4], 0 }
   0x3   :  { %13 = vsyncpa [#allocation4 + $0x1], 0  ;;  %s647_s12 = smov 0   ;;  %s649_s13 = smov 0  }
   0x4   :  { %s651_s14 = smov 0   ;;  %s653_s15 = smov 0  }
   0x5   :  { %s655_s16 = smov 0   ;;  %s657_s17 = smov 0  }
   0x6 LB: > { %s427_s18 = sadd.s32 4294967295, %s624_s17   ;;  %s428_s19 = sadd.s32 4294967294, %s624_s17   ;;  %s624_s17 = sphi %s657_s17, %s19_s17   ;;  %s620_s16 = sphi %s655_s16, %s802_s16   ;;  %s616_s15 = sphi %s653_s15, %s801_s15   ;;  %s612_s14 = sphi %s651_s14, %s800_s14   ;;  %s608_s13 = sphi %s649_s13, %s799_s13   ;;  %s604_s12 = sphi %s647_s12, %s798_s12  }
   0x7   : > { %s31_s20 = sadd.s32 1, %s620_s16  ;;  %s40_s21 = sadd.s32 1, %s612_s14 }
   0x8   : > { %p33_p0 = scmp.ge.s32.totalorder %s31_s20, 2  ;;  %p47_p1 = scmp.ne.s32.totalorder %s612_s14, %s608_s13 }
   0x9   : > { %p48_p2 = scmp.eq.s32.totalorder %s624_s17, 0  ;;  %p53_p3 = scmp.ne.s32.totalorder %s608_s13, %s604_s12 }
   0xa   : > { %s804_s20 = smov (%p33_p0, %s31_s20), 0  ;;  %p54_p5 = scmp.eq.s32.totalorder %s427_s18, 0 }
   0xb   : > { %p688_p4 = por %p48_p2, %p47_p1  ;;  %s35_s23 = ssub.s32 %s620_s16, %s804_s20 }
   0xc   : > { %p121_p6 = scmp.eq.s32.totalorder %s427_s18, 1  ;;  %p38_p7 = scmp.eq.s32.totalorder %s35_s23, 0 }
   0xd   : > { %p694_p8 = por %p54_p5, %p53_p3  ;;  %p127_p10 = scmp.eq.s32.totalorder %s428_s19, 1 }
   0xe   : > { %p698_p9 = por %p121_p6, %p47_p1  ;;  %p430_p12 = scmp.ge.s32.totalorder %s624_s17, 2 }
   0xf   : > { %s703_s26 = scalar_select %p38_p7, %s612_s14, %s40_s21  }
  0x10   : > { %p705_p11 = por %p127_p10, %p53_p3  ;;  %p456_p13 = scmp.lt.s32.totalorder %s624_s17, 2 }
  0x11   : > { %s153_s28 = sand.u32 1, %s612_s14   ;;  %s442_s30 = sshll.u32 %s620_s16, 3 }
  0x12   : > { %s431_s29 = sshll.u32 %s153_s28, 3  ;;  %s164_s6 = scalar_lea.hbm %s790_s0, %s442_s30 }
  0x13   : > { %s157_s7 = scalar_lea.vmem [#allocation2], %s431_s29  ;;  %s166_s9 = sshll.u32 %s164_s6, 4  ;;  %s167_s9 = int_to_ptr.hbm [resolvable:$true] %s166_s9 }
  0x14   : > { %s168_s8 = sshll.u32 %s157_s7, 4  ;;  %p449_p0 = pnand %p456_p13, %p688_p4  ;;  %s169_s8 = int_to_ptr.vmem [resolvable:$true] %s168_s8 }
  0x15   : > { %p434_p1 = scmp.ge.s32.totalorder %s624_s17, 1  ;;  %p173_p2 = scmp.lt.s32.totalorder %s624_s17, 3 }
  0x16   : > { %s154_s10 = scalar_lea.sflag [#allocation3], %s153_s28 }
  0x17   : > { %451 = dma.hbm_to_vmem [thread:$0]  (!%p449_p0), %s167_s9, 128, %s169_s8, %s154_s10  }
  0x18   : > { %p174_p3 = pnand %p434_p1, %p173_p2 }
  0x19   : > { %s721_s11 = sand.u32 (!%p174_p3), 1, %s608_s13  }
  0x1a   : > { %177 = sbr.rel (%p174_p3) target bundleno = 165 (0xa5), region = 32  ;;  %s435_s18 = sshll.u32 (!%p174_p3), %s721_s11, 3 }
  0x1b   : > { %s180_s19 = scalar_lea.sflag (!%p174_p3), [#allocation3], %s721_s11  ;;  %s183_s21 = scalar_lea.vmem (!%p174_p3), [#allocation2], %s435_s18 }
  0x1f   : > { %595 = dma.done.wait (%p694_p8), %s180_s19, 128  }
  0x20   : > { %597 = vsyncadd (%p694_p8), %s180_s19, 4294967168  ;;  %v626_v0 = vmov 0   ;;  %v731_v1 = vld [vmem:[%s183_s21] sm:$0xff]  ;;  %v296_v2 = vld [vmem:[%s791_s1] sm:$0xf]  ;;  %vm216_vm0 = vcmask 1043456  }
  0x21   : > { %507 = vset.pattern.permute.xlu0 %v626_v0  ;;  %211 = vst [vmem:[#allocation1] ss:$2 sm:$0xff] %v731_v1  ;;  %v297_v3 = vld [vmem:[%s792_s2] sm:$0xf]  ;;  %v231_v4 = vmul.f32 %v731_v1, %v731_v1  ;;  %s443_s24 = sshll.u32 %s616_s15, 3  ;;  %s206_s6 = scalar_lea.vmem [#allocation5], %s435_s18 }
  0x22   : > { %300 = vperm.xlu0 %507, %v296_v2   ;;  %s338_s5 = scalar_lea.hbm %s793_s3, %s443_s24  ;;  %s340_s7 = sshll.u32 %s206_s6, 4  ;;  %s341_s7 = int_to_ptr.vmem [resolvable:$true] %s340_s7 }
  0x23   : > { %s342_s8 = sshll.u32 %s338_s5, 4  ;;  %s325_s15 = scalar_lea.sflag [#allocation4], %s721_s11  ;;  %s343_s8 = int_to_ptr.hbm [resolvable:$true] %s342_s8 }
  0x24   : > { %s556_s9 = sshra.s32 %s343_s8, 4  ;;  %s562_s18 = scalar_lea.hbm %s793_s3, 16  ;;  %s557_s9 = int_to_ptr.hbm [resolvable:$true] %s556_s9 }
  0x25   : > { %s558_s10 = scalar_lea.hbm %s557_s9, 8  ;;  %p563_p7 = scmp.lt.s32.totalorder %s557_s9, %s793_s3 }
  0x26   : > { %p559_p4 = scmp.ne.s32.totalorder %s557_s9, %s558_s10  ;;  %p564_p8 = scmp.lt.s32.totalorder %s562_s18, %s558_s10 }
  0x28   : > { %v212_v5 = vld.sshfl [vmem:[#allocation1] sm:$0xff pattern:$0x75316420]  ;;  %v213_v6 = vld.sshfl [vmem:[#allocation1 + $0x8] sm:$0xff pattern:$0x75316420]  ;;  %p560_p5 = pnand %p559_p4, %p698_p9  ;;  %p565_p10 = por %p564_p8, %p563_p7 }
  0x29   : > { %233 = vst [vmem:[#allocation1] ss:$2 sm:$0xff] %v231_v4  ;;  %v224_v7 = vsel %vm216_vm0, %v213_v6, 0.0  ;;  %v217_v10 = vsel %vm216_vm0, %v212_v5, 0.0 }
  0x2a   : > { %313 = vperm.xlu0 %507, %v297_v3   ;;  %v225_v8 = vrot.slane %v224_v7, 4  ;;  %v218_v12 = vrot.slane %v217_v10, 4  ;;  %p561_p6 = pneg %p560_p5 }
  0x2c   : > { %v226_v13 = vadd.f32 %v225_v8, %v224_v7  ;;  %v219_v17 = vadd.f32 %v218_v12, %v217_v10  ;;  %p566_p13 = pnand %p565_p10, %p561_p6 }
  0x2e   : > { %v227_v18 = vrot.slane %v226_v13, 2  ;;  %v220_v21 = vrot.slane %v219_v17, 2 }
  0x30   : > { %v235_v9 = vld.sshfl [vmem:[#allocation1 + $0x8] sm:$0xff pattern:$0x75316420]  ;;  %v234_v14 = vld.sshfl [vmem:[#allocation1] sm:$0xff pattern:$0x75316420]  ;;  %v228_v22 = vadd.f32 %v227_v18, %v226_v13  ;;  %v221_v25 = vadd.f32 %v220_v21, %v219_v17 }
  0x31   : > { %v245_v11 = vsel %vm216_vm0, %v235_v9, 0.0  ;;  %v238_v16 = vsel %vm216_vm0, %v234_v14, 0.0 }
  0x32   : > { %v246_v15 = vrot.slane %v245_v11, 4  ;;  %v239_v19 = vrot.slane %v238_v16, 4  ;;  %v229_v26 = vrot.slane %v228_v22, 1  ;;  %v222_v29 = vrot.slane %v221_v25, 1 }
  0x34   : > { %v247_v20 = vadd.f32 %v246_v15, %v245_v11  ;;  %v240_v23 = vadd.f32 %v239_v19, %v238_v16  ;;  %v230_v30 = vadd.f32 %v229_v26, %v228_v22  ;;  %v223_v33 = vadd.f32 %v222_v29, %v221_v25 }
  0x36   : > { %v248_v24 = vrot.slane %v247_v20, 2  ;;  %v241_v27 = vrot.slane %v240_v23, 2  ;;  %v253_v36 = vmul.f32 0.25, %v230_v30  ;;  %v252_v38 = vmul.f32 0.25, %v223_v33 }
  0x38   : > { %v249_v28 = vadd.f32 %v248_v24, %v247_v20  ;;  %v242_v31 = vadd.f32 %v241_v27, %v240_v23  ;;  %v257_v40 = vmul.f32 %v253_v36, %v253_v36  ;;  %v256_v42 = vmul.f32 %v252_v38, %v252_v38 }
  0x39   : > { %v264_v60 = vrot.slane %v253_v36, 4 }
  0x3a   : > { %v250_v32 = vrot.slane %v249_v28, 1  ;;  %v243_v34 = vrot.slane %v242_v31, 1 }
  0x3b   : > { %v265_v63 = vsel %vm216_vm0, %v252_v38, %v264_v60 }
  0x3c   : > { %v251_v35 = vadd.f32 %v250_v32, %v249_v28  ;;  %v244_v37 = vadd.f32 %v243_v34, %v242_v31  ;;  %v267_v2 = vsub.f32 %v731_v1, %v265_v63 }
  0x3e   : > { %v255_v39 = vmul.f32 0.25, %v251_v35  ;;  %v254_v41 = vmul.f32 0.25, %v244_v37 }
  0x40   : > { %v259_v43 = vsub.f32 %v255_v39, %v257_v40  ;;  %v258_v44 = vsub.f32 %v254_v41, %v256_v42 }
  0x42   : > { %v261_v45 = vmax.f32 %v259_v43, 0.0  ;;  %v260_v46 = vmax.f32 %v258_v44, 0.0 }
  0x44   : > { %v269_v47 = vadd.f32 1e-06, %v261_v45  ;;  %v268_v48 = vadd.f32 1e-06, %v260_v46 }
  0x46   : > { %508 = vrsqrt.f32 %v269_v47  ;;  %vm286_vm1 = vweird.f32 %v269_v47  ;;  %vm276_vm4 = vweird.f32 %v268_v48 }
  0x47   : > { %510 = vrsqrt.f32 %v268_v48 }
  0x4c   : > { %v509_v49 = vpop.eup %508 }
  0x4d   : > { %v281_v50 = vmul.f32 %v509_v49, %v269_v47  ;;  %v511_v51 = vpop.eup %510  ;;  %vm287_vm2 = vweird.f32 %v509_v49 }
  0x4e   : > { %v271_v52 = vmul.f32 %v511_v51, %v268_v48  ;;  %vm288_vm3 = vmor %vm286_vm1, %vm287_vm2  ;;  %vm277_vm5 = vweird.f32 %v511_v51 }
  0x4f   : > { %v282_v53 = vmul.f32 %v509_v49, %v281_v50  ;;  %vm278_vm6 = vmor %vm276_vm4, %vm277_vm5 }
  0x50   : > { %v272_v54 = vmul.f32 %v511_v51, %v271_v52 }
  0x51   : > { %v283_v55 = vmul.f32 0.5, %v282_v53 }
  0x52   : > { %v273_v56 = vmul.f32 0.5, %v272_v54 }
  0x53   : > { %v284_v57 = vsub.f32 1.5, %v283_v55 }
  0x54   : > { %v274_v58 = vsub.f32 1.5, %v273_v56 }
  0x55   : > { %v285_v59 = vmul.f32 %v509_v49, %v284_v57 }
  0x56   : > { %v275_v61 = vmul.f32 %v511_v51, %v274_v58 }
  0x57   : > { %v289_v62 = vsel %vm288_vm3, %v509_v49, %v285_v59 }
  0x58   : > { %v292_v0 = vrot.slane %v289_v62, 4  ;;  %v279_v3 = vsel %vm278_vm6, %v511_v51, %v275_v61 }
  0x5a   : > { %v293_v4 = vsel %vm216_vm0, %v279_v3, %v292_v0 }
  0x5b   : > { %v295_v5 = vmul.f32 %v293_v4, %v267_v2 }
  0x5d   : > { %304 = vst [vmem:[#allocation1] ss:$2 sm:$0xff] %v295_v5 }
  0x64   : > { %v306_v7 = vld.sshfl [vmem:[#allocation1 + $0x8] sm:$0xff pattern:$0x75316420]  ;;  %v305_v8 = vld.sshfl [vmem:[#allocation1] sm:$0xff pattern:$0x75316420] }
  0x94   : > { %v301_v6 = vpop.permute.xlu0 %300 }
  0x95   : > { %v310_v9 = vmul.f32 %v306_v7, %v301_v6  ;;  %v309_v11 = vmul.f32 %v305_v8, %v301_v6 }
  0x9c   : > { %v314_v10 = vpop.permute.xlu0 %313 }
  0x9d   : > { %v317_v12 = vadd.f32 %v314_v10, %v310_v9  ;;  %v316_v1 = vadd.f32 %v314_v10, %v309_v11 }
  0x9f   : > { %v320_v13 = vrot.slane %v317_v12, 4 }
  0xa1   : > { %v321_v14 = vsel %vm216_vm0, %v316_v1, %v320_v13 }
  0xa2   : > { %323 = vst [vmem:[%s206_s6] sm:$0xff] %v321_v14 }
  0xa3   : > { %569 = shalt.err (!%p566_p13)
}
  0xa4   : > { %446 = dma.vmem_to_hbm [thread:$0]  (%p698_p9), %s341_s7, 128, %s343_s8, %s325_s15  }
  0xa5 PF: > { %s354_s11 = sand.u32 1, %s604_s12   ;;  %p453_p0 = pnand %p430_p12, %p705_p11 }
  0xa6   : > { %s355_s28 = scalar_lea.sflag [#allocation4], %s354_s11 }
  0xa7   : > { %p454_p1 = pneg %p453_p0 }
  0xa9   : > { %599 = dma.done.wait (%p454_p1), %s355_s28, 128  }
  0xaa   : > { %601 = vsyncadd (%p454_p1), %s355_s28, 4294967168  ;;  %s19_s17 = sadd.s32 1, %s624_s17   ;;  %s798_s12 = smov %s608_s13 }
  0xab   : > { %p16_p2 = scmp.ge.s32.totalorder %s19_s17, 4   ;;  %s799_s13 = smov %s612_s14 }
  0xac   : > { %s800_s14 = smov %s703_s26  ;;  %s801_s15 = smov %s620_s16 }
  0xad   : > { %s802_s16 = smov %s804_s20  ;;  %18 = sbr.rel (!%p16_p2) target bundleno = 6 (0x6), region = 77 }
  0xb2   :  { %361 = vsyncpa [#allocation3], 1 }
  0xb3   :  { %363 = vsyncpa [#allocation3 + $0x1], 1 }
  0xb4   :  { %364 = vsyncpa [#allocation4], 1 }
  0xb5   :  { %366 = vsyncpa [#allocation4 + $0x1], 1 }

</bundles_post_ra>
